<compile_context>
chip_gen: v5e
topology: v5e:2x2
jax: 0.10.0
libtpu: 0.0.40
codegen_flags: <defaults>
</compile_context>

<pallas_src>
import functools

import jax
import jax.numpy as jnp
from jax import lax
from jax.experimental import pallas as pl
from jax.experimental.pallas import tpu as pltpu

_LANE_ALIGN = 256          # vocab tiles 256-aligned: full MXU output width on v6e/v7x
_MAX_VOCAB_SPLITS = 2      # at most one vocab split per TensorCore (v7x has 2 TCs)


def _round_up(x: int, m: int) -> int:
    return ((x + m - 1) // m) * m


def _tpu_info():
    try:
        return pltpu.get_tpu_info()
    except Exception:
        return None


def _vmem_capacity_bytes() -> int:
    info = _tpu_info()
    cap = getattr(info, "vmem_capacity_bytes", None) if info is not None else None
    if isinstance(cap, int) and cap > 0:
        return cap
    return 64 << 20        # conservative (v7x-sized) fallback


def _num_tensorcores() -> int:
    info = _tpu_info()
    for name in ("num_cores", "core_count", "num_tensorcores",
                 "tensor_cores_per_chip", "cores_per_chip", "num_cores_per_chip"):
        n = getattr(info, name, None) if info is not None else None
        if isinstance(n, int) and n > 0:
            return n
    devs = jax.devices()
    d = devs[0] if devs else None
    for name in ("num_cores", "core_count"):
        n = getattr(d, name, None) if d is not None else None
        if isinstance(n, int) and n > 0:
            return n
    return 1               # safe default: single-TC chips (v5e/v6e)


def _choose_v_tile(v: int, h: int, b: int, itemsize: int, vmem_cap: int) -> int:
    """Largest 256-aligned vocab tile whose working set fits the VMEM budget.

    Accounts for the double-buffered embedding tile, the streamed bias tile and
    ~3 f32 [B, v_tile] temporaries (logits + mask/select intermediates).
    """
    budget = (64 << 20) if vmem_cap >= (100 << 20) else (24 << 20)
    b_rows = max(b, 8)                                  # sublane padding
    per_col = 2 * h * itemsize + 3 * b_rows * 4 + 2 * 4
    vt = budget // per_col
    vt = max(_LANE_ALIGN, (vt // _LANE_ALIGN) * _LANE_ALIGN)
    vt = min(vt, _round_up(v, _LANE_ALIGN))
    return int(vt)


def _make_sampler_kernel(*, v_total, v_tile, tiles_per_split, apply_mask, has_bias):
    def body(x_ref, emb_ref, bias_ref, max_ref, arg_ref, max_sc, arg_sc):
        c = pl.program_id(0)          # vocab split (core-parallel axis)
        j = pl.program_id(1)          # vocab tile within split (reduction axis)

        @pl.when(j == 0)
        def _init():
            max_sc[...] = jnp.full_like(max_sc, -jnp.inf)
            arg_sc[...] = jnp.zeros_like(arg_sc)

        tile_idx = c * tiles_per_split + j
        col0 = pl.multiple_of(tile_idx * v_tile, _LANE_ALIGN)

        # logits tile: [B, V_TILE] = x [B, H] @ emb_tile [V_TILE, H]^T
        # operands stay in their native dtype (bf16/f32); f32 MXU accumulation.
        logits = lax.dot_general(
            x_ref[...], emb_ref[...],
            dimension_numbers=(((1,), (1,)), ((), ())),
            preferred_element_type=jnp.float32,
        )
        if has_bias:
            logits = logits + bias_ref[...]            # streamed (1, v_tile) tile

        local_ids = lax.broadcasted_iota(jnp.int32, (1, v_tile), 1)   # [1, v_tile]
        if apply_mask:
            # only the ragged tail (and any fully-padded fallback tile) needs
            # masking; the scalar cutoff keeps this a single VPU select and is
            # a no-op (cutoff == v_tile) for all interior tiles.
            cutoff = jnp.clip(v_total - col0, 0, v_tile)
            logits = jnp.where(local_ids < cutoff, logits, -jnp.inf)

        # first-occurrence argmax within the tile (matches torch/jnp tie-break)
        tile_max = jnp.max(logits, axis=-1, keepdims=True)            # [B, 1]
        gids = local_ids + col0
        big = jnp.array(jnp.iinfo(jnp.int32).max, jnp.int32)
        tile_arg = jnp.min(jnp.where(logits == tile_max, gids, big),
                           axis=-1, keepdims=True)                    # [B, 1]

        # running accumulator in VMEM scratch; strict `>` keeps first occurrence.
        better = tile_max > max_sc[...]
        arg_sc[...] = jnp.where(better, tile_arg, arg_sc[...])
        max_sc[...] = jnp.where(better, tile_max, max_sc[...])

        # single lane-dense-ish finalize store per split (no per-step masked vst)
        @pl.when(j == tiles_per_split - 1)
        def _finalize():
            max_ref[...] = max_sc[...]
            arg_ref[...] = arg_sc[...]

    if has_bias:
        def kernel(x_ref, emb_ref, bias_ref, max_ref, arg_ref, max_sc, arg_sc):
            body(x_ref, emb_ref, bias_ref, max_ref, arg_ref, max_sc, arg_sc)
    else:
        def kernel(x_ref, emb_ref, max_ref, arg_ref, max_sc, arg_sc):
            body(x_ref, emb_ref, None, max_ref, arg_ref, max_sc, arg_sc)
    return kernel


def sampler_forward(embedding, x, output_pos, temperature, topp, topk,
                    embedding_bias=None):
    """JAX/Pallas equivalent of Sampler.forward (greedy argmax path).

    Output ids are int32 (torch.argmax returns int64); identical values for
    vocab sizes < 2**31.
    """
    # glue: index_select along seq dim + squeeze -> [B, H]
    x_sel = jnp.squeeze(jnp.take(x, output_pos, axis=1), axis=1)
    x_sel = x_sel.astype(embedding.dtype)          # tiny [B, H] cast; embedding stays native
    B, H = x_sel.shape
    V = embedding.shape[0]
    has_bias = embedding_bias is not None

    itemsize = jnp.dtype(embedding.dtype).itemsize
    vmem_cap = _vmem_capacity_bytes()

    # --- tiling: exact vocab coverage, split across TensorCores when available.
    v_tile = _choose_v_tile(V, H, B, itemsize, vmem_cap)
    n_blocks = pl.cdiv(V, v_tile)
    splits = max(1, min(_num_tensorcores(), _MAX_VOCAB_SPLITS, n_blocks))
    tiles_per_split = pl.cdiv(n_blocks, splits)
    if splits > 1 and n_blocks % splits != 0:
        # try to shrink v_tile so splits * tiles_per_split covers V exactly
        n_total = splits * tiles_per_split
        cand = _round_up(pl.cdiv(V, n_total), _LANE_ALIGN)
        if pl.cdiv(V, cand) == n_total:
            v_tile, n_blocks = cand, n_total
    total_tiles = splits * tiles_per_split
    v_full = total_tiles * v_tile
    apply_mask = (v_full != V)

    if total_tiles == n_blocks:
        # exact coverage: no re-read of the last embedding block
        emb_index_map = lambda c, j: (c * tiles_per_split + j, 0)
    else:
        # fallback (no 256-aligned exact tiling exists): padded tiles re-read the
        # last valid block and are masked to -inf in-kernel.
        last = n_blocks - 1
        emb_index_map = lambda c, j: (jnp.minimum(c * tiles_per_split + j, last), 0)

    in_specs = [
        pl.BlockSpec((B, H), lambda c, j: (0, 0)),          # x_sel (resident)
        pl.BlockSpec((v_tile, H), emb_index_map),           # embedding (streamed, native dtype)
    ]
    args = [x_sel, embedding]
    if has_bias:
        bias2d = jnp.zeros((1, v_full), jnp.float32)
        bias2d = bias2d.at[0, :V].set(embedding_bias.astype(jnp.float32).reshape(V))
        in_specs.append(
            pl.BlockSpec((1, v_tile), lambda c, j: (0, c * tiles_per_split + j)))
        args.append(bias2d)

    kernel = _make_sampler_kernel(v_total=V, v_tile=v_tile,
                                  tiles_per_split=tiles_per_split,
                                  apply_mask=apply_mask, has_bias=has_bias)

    # --- VMEM accounting (embedding double-buffer + bias stream + f32 temps)
    b_rows = max(B, 8)
    vmem_need = (2 * v_tile * H * itemsize
                 + (2 * v_tile * 4 if has_bias else 0)
                 + 3 * b_rows * v_tile * 4
                 + 2 * b_rows * H * itemsize
                 + (1 << 16))
    vmem_limit = int(min(max(vmem_need + (8 << 20), 32 << 20),
                         vmem_cap - (2 << 20)))
    vmem_limit = int(max(vmem_limit, vmem_need + (1 << 20)))   # never below the need

    bytes_accessed = (V * H * itemsize + B * H * itemsize
                      + (v_full * 4 if has_bias else 0) + splits * B * 8)
    cost = pl.CostEstimate(flops=2 * B * H * v_full, transcendentals=0,
                           bytes_accessed=bytes_accessed)

    # NOTE: `temperature` is a tensor (not None), so — exactly like the torch
    # module — this is the greedy argmax path; temperature/topp/topk are unused.
    # TODO(synk): the top-p/top-k multinomial branch in the reference module is
    # unreachable dead code (it sits after the greedy `return`), so it is not
    # implemented here.
    # TODO(synk): optional ~2x roofline shift via int8 (v5e/v6e) / fp8 (v7x)
    # embedding streaming is not enabled; it changes numerics.
    if splits > 1:
        cand_sems = []
        cp = getattr(pltpu, "CORE_PARALLEL", None)
        if cp is not None:
            cand_sems.append((cp, getattr(pltpu, "ARBITRARY", "arbitrary")))
        cand_sems.append(("parallel", "arbitrary"))
    else:
        cand_sems = [("arbitrary", "arbitrary")]

    def run(sems):
        return pl.pallas_call(
            kernel,
            out_shape=(
                jax.ShapeDtypeStruct((splits, B, 1), jnp.float32),
                jax.ShapeDtypeStruct((splits, B, 1), jnp.int32),
            ),
            grid_spec=pltpu.PrefetchScalarGridSpec(
                num_scalar_prefetch=0,
                grid=(splits, tiles_per_split),
                in_specs=in_specs,
                out_specs=(
                    pl.BlockSpec((None, B, 1), lambda c, j: (c, 0, 0)),  # per-split max
                    pl.BlockSpec((None, B, 1), lambda c, j: (c, 0, 0)),  # per-split argmax
                ),
                scratch_shapes=[
                    pltpu.VMEM((B, 1), jnp.float32),   # running max
                    pltpu.VMEM((B, 1), jnp.int32),     # running argmax
                ],
            ),
            compiler_params=pltpu.CompilerParams(
                dimension_semantics=sems, vmem_limit_bytes=vmem_limit),
            cost_estimate=cost,
        )(*args)

    results = None
    last_err = None
    for sems in cand_sems:
        try:
            results = run(sems)
            if len(cand_sems) > 1:
                results = jax.block_until_ready(results)  # surface lowering errors before accepting
            break
        except Exception as e:                            # fall back from CORE_PARALLEL
            last_err = e
            results = None
    if results is None:
        raise last_err
    part_max, part_arg = results

    # combine per-split partials; jnp.argmax's first-occurrence tie-break picks
    # the lower split, i.e. the lower vocab index, matching torch.
    pm = part_max[..., 0]                         # [C, B]
    pa = part_arg[..., 0]                         # [C, B]
    best_split = jnp.argmax(pm, axis=0)           # [B]
    ids = jnp.take_along_axis(pa, best_split[None, :], axis=0)[0]
    return ids


if __name__ == "__main__":
    B, S, H, V = 2, 8, 32, 1000   # V deliberately not a multiple of the tile

    key = jax.random.PRNGKey(0)
    k_emb, k_x, k_bias = jax.random.split(key, 3)

    embedding = jax.random.normal(k_emb, (V, H), dtype=jnp.float32).astype(jnp.bfloat16)
    x = jax.random.normal(k_x, (B, S, H), dtype=jnp.float32).astype(jnp.bfloat16)
    embedding_bias = 0.1 * jax.random.normal(k_bias, (V,), dtype=jnp.float32)

    output_pos = jnp.array([5], dtype=jnp.int32)
    temperature = jnp.array([1.0, 0.8], dtype=jnp.float32)
    topp = jnp.array([0.9, 0.9], dtype=jnp.float32)
    topk = jnp.array([10, 10], dtype=jnp.int32)

    next_ids = sampler_forward(embedding, x, output_pos, temperature,
                               topp, topk, embedding_bias)
    next_ids = jax.block_until_ready(next_ids)

    # reference check in plain JAX (same native-dtype matmul, f32 accumulation)
    x_sel = x[:, output_pos[0], :].astype(embedding.dtype)
    ref_logits = lax.dot_general(
        x_sel, embedding, dimension_numbers=(((1,), (1,)), ((), ())),
        preferred_element_type=jnp.float32) + embedding_bias[None, :]
    ref_ids = jnp.argmax(ref_logits, axis=-1).astype(jnp.int32)

    assert next_ids.shape == (B,)
    assert bool(jnp.all(next_ids == ref_ids))

    print("KERNEL_OK")
</pallas_src>

<mosaic_0001>
module attributes {stable_mosaic.version = 11 : i64} {
  func.func @kernel(%arg0: i32, %arg1: i32, %arg2: memref<2x32xbf16, #tpu.memory_space<vmem>>, %arg3: memref<1024x32xbf16, #tpu.memory_space<vmem>>, %arg4: memref<1x1024xf32, #tpu.memory_space<vmem>>, %arg5: memref<1x2x1xf32, #tpu.memory_space<vmem>>, %arg6: memref<1x2x1xi32, #tpu.memory_space<vmem>>, %arg7: memref<2x1xf32, #tpu.memory_space<vmem>>, %arg8: memref<2x1xi32, #tpu.memory_space<vmem>>) attributes {dimension_semantics = [#tpu.dimension_semantics<arbitrary>, #tpu.dimension_semantics<arbitrary>], iteration_bounds = array<i64: 1, 1>, scalar_prefetch = 0 : i64, scratch_operands = 2 : i64, tpu.core_type = #tpu.core_type<tc>, window_params = [{pipeline_mode = #tpu.pipeline_mode<synchronous>, transform_indices = @transform_0, window_bounds = array<i64: 2, 32>}, {transform_indices = @transform_1, window_bounds = array<i64: 1024, 32>}, {transform_indices = @transform_2, window_bounds = array<i64: 1, 1024>}, {transform_indices = @transform_3, window_bounds = array<i64: 1, 2, 1>}, {transform_indices = @transform_4, window_bounds = array<i64: 1, 2, 1>}]} {
    %c0_i32 = arith.constant 0 : i32
    %0 = arith.cmpi eq, %arg1, %c0_i32 : i32
    %1 = arith.extui %0 : i1 to i32
    %c0_i32_0 = arith.constant 0 : i32
    %2 = arith.cmpi ne, %1, %c0_i32_0 : i32
    scf.if %2 {
      %cst_23 = arith.constant 0xFF800000 : f32
      %46 = vector.broadcast %cst_23 : f32 to vector<2x1xf32>
      %c0_24 = arith.constant 0 : index
      %c0_25 = arith.constant 0 : index
      %47 = vector.load %arg7[%c0_24, %c0_25] : memref<2x1xf32, #tpu.memory_space<vmem>>, vector<2x1xf32>
      tpu.vector_store %arg7[%c0_24, %c0_25], %46 {strides = array<i32>} : memref<2x1xf32, #tpu.memory_space<vmem>>, vector<2x1xf32>,
      %c0_i32_26 = arith.constant 0 : i32
      %48 = vector.broadcast %c0_i32_26 : i32 to vector<2x1xi32>
      %c0_27 = arith.constant 0 : index
      %c0_28 = arith.constant 0 : index
      %49 = vector.load %arg8[%c0_27, %c0_28] : memref<2x1xi32, #tpu.memory_space<vmem>>, vector<2x1xi32>
      tpu.vector_store %arg8[%c0_27, %c0_28], %48 {strides = array<i32>} : memref<2x1xi32, #tpu.memory_space<vmem>>, vector<2x1xi32>,
    } else {
    }
    %c1_i32 = arith.constant 1 : i32
    %3 = arith.muli %arg0, %c1_i32 : i32
    %4 = arith.addi %3, %arg1 : i32
    %c1024_i32 = arith.constant 1024 : i32
    %5 = arith.muli %4, %c1024_i32 : i32
    %6 = tpu.assume_multiple %5, 256 : i32
    %c0 = arith.constant 0 : index
    %c0_1 = arith.constant 0 : index
    %7 = vector.load %arg2[%c0, %c0_1] : memref<2x32xbf16, #tpu.memory_space<vmem>>, vector<2x32xbf16>
    %c0_2 = arith.constant 0 : index
    %c0_3 = arith.constant 0 : index
    %8 = vector.load %arg3[%c0_2, %c0_3] : memref<1024x32xbf16, #tpu.memory_space<vmem>>, vector<1024x32xbf16>
    %cst = arith.constant dense<0.000000e+00> : vector<2x1024xf32>
    %9 = tpu.matmul %7, %8, %cst {dimension_numbers = #tpu.dot_dimension_numbers<[1], [1], [0], [0], [0, 0, 1, 0], [], []>} : vector<2x32xbf16>, vector<1024x32xbf16>, vector<2x1024xf32> -> vector<2x1024xf32>
    %c0_4 = arith.constant 0 : index
    %c0_5 = arith.constant 0 : index
    %10 = vector.load %arg4[%c0_4, %c0_5] : memref<1x1024xf32, #tpu.memory_space<vmem>>, vector<1x1024xf32>
    %11 = vector.broadcast %10 : vector<1x1024xf32> to vector<2x1024xf32>
    %12 = arith.addf %9, %11 : vector<2x1024xf32>
    %13 = tpu.iota {dimensions = array<i32: 1>} : vector<1x1024xi32>
    %c1000_i32 = arith.constant 1000 : i32
    %14 = arith.subi %c1000_i32, %6 : i32
    %c0_i32_6 = arith.constant 0 : i32
    %c1024_i32_7 = arith.constant 1024 : i32
    %15 = arith.maxsi %c0_i32_6, %14 : i32
    %16 = arith.minsi %c1024_i32_7, %15 : i32
    %17 = vector.broadcast %16 : i32 to vector<1x1024xi32>
    %18 = arith.cmpi slt, %13, %17 : vector<1x1024xi32>
    %cst_8 = arith.constant 0xFF800000 : f32
    %19 = vector.shape_cast %18 : vector<1x1024xi1> to vector<1x1024xi1>
    %20 = vector.broadcast %19 : vector<1x1024xi1> to vector<2x1024xi1>
    %21 = vector.broadcast %cst_8 : f32 to vector<2x1024xf32>
    %22 = arith.select %20, %12, %21 : vector<2x1024xi1>, vector<2x1024xf32>
    %cst_9 = arith.constant dense<0xFF800000> : vector<2xf32>
    %23 = vector.multi_reduction <maximumf>, %22, %cst_9 [1] : vector<2x1024xf32> to vector<2xf32>
    %24 = vector.shape_cast %23 : vector<2xf32> to vector<2x1xf32>
    %25 = vector.broadcast %6 : i32 to vector<1x1024xi32>
    %26 = arith.addi %13, %25 : vector<1x1024xi32>
    %27 = vector.broadcast %24 : vector<2x1xf32> to vector<2x1024xf32>
    %28 = arith.cmpf oeq, %22, %27 : vector<2x1024xf32>
    %c2147483647_i32 = arith.constant 2147483647 : i32
    %29 = vector.shape_cast %26 : vector<1x1024xi32> to vector<1x1024xi32>
    %30 = vector.broadcast %29 : vector<1x1024xi32> to vector<2x1024xi32>
    %31 = vector.broadcast %c2147483647_i32 : i32 to vector<2x1024xi32>
    %32 = arith.select %28, %30, %31 : vector<2x1024xi1>, vector<2x1024xi32>
    %cst_10 = arith.constant dense<2147483647> : vector<2xi32>
    %33 = vector.multi_reduction <minsi>, %32, %cst_10 [1] : vector<2x1024xi32> to vector<2xi32>
    %34 = vector.shape_cast %33 : vector<2xi32> to vector<2x1xi32>
    %c0_11 = arith.constant 0 : index
    %c0_12 = arith.constant 0 : index
    %35 = vector.load %arg7[%c0_11, %c0_12] : memref<2x1xf32, #tpu.memory_space<vmem>>, vector<2x1xf32>
    %36 = arith.cmpf ogt, %24, %35 : vector<2x1xf32>
    %c0_13 = arith.constant 0 : index
    %c0_14 = arith.constant 0 : index
    %37 = vector.load %arg8[%c0_13, %c0_14] : memref<2x1xi32, #tpu.memory_space<vmem>>, vector<2x1xi32>
    %38 = arith.select %36, %34, %37 : vector<2x1xi1>, vector<2x1xi32>
    %c0_15 = arith.constant 0 : index
    %c0_16 = arith.constant 0 : index
    %39 = vector.load %arg8[%c0_15, %c0_16] : memref<2x1xi32, #tpu.memory_space<vmem>>, vector<2x1xi32>
    tpu.vector_store %arg8[%c0_15, %c0_16], %38 {strides = array<i32>} : memref<2x1xi32, #tpu.memory_space<vmem>>, vector<2x1xi32>,
    %c0_17 = arith.constant 0 : index
    %c0_18 = arith.constant 0 : index
    %40 = vector.load %arg7[%c0_17, %c0_18] : memref<2x1xf32, #tpu.memory_space<vmem>>, vector<2x1xf32>
    %41 = arith.select %36, %24, %40 : vector<2x1xi1>, vector<2x1xf32>
    %c0_19 = arith.constant 0 : index
    %c0_20 = arith.constant 0 : index
    %42 = vector.load %arg7[%c0_19, %c0_20] : memref<2x1xf32, #tpu.memory_space<vmem>>, vector<2x1xf32>
    tpu.vector_store %arg7[%c0_19, %c0_20], %41 {strides = array<i32>} : memref<2x1xf32, #tpu.memory_space<vmem>>, vector<2x1xf32>,
    %c0_i32_21 = arith.constant 0 : i32
    %43 = arith.cmpi eq, %arg1, %c0_i32_21 : i32
    %44 = arith.extui %43 : i1 to i32
    %c0_i32_22 = arith.constant 0 : i32
    %45 = arith.cmpi ne, %44, %c0_i32_22 : i32
    scf.if %45 {
      %c0_23 = arith.constant 0 : index
      %c0_24 = arith.constant 0 : index
      %46 = vector.load %arg7[%c0_23, %c0_24] : memref<2x1xf32, #tpu.memory_space<vmem>>, vector<2x1xf32>
      %c0_25 = arith.constant 0 : index
      %c0_26 = arith.constant 0 : index
      %c0_27 = arith.constant 0 : index
      %47 = vector.load %arg5[%c0_25, %c0_26, %c0_27] : memref<1x2x1xf32, #tpu.memory_space<vmem>>, vector<1x2x1xf32>
      %48 = vector.shape_cast %47 : vector<1x2x1xf32> to vector<2x1xf32>
      %49 = vector.shape_cast %46 : vector<2x1xf32> to vector<1x2x1xf32>
      tpu.vector_store %arg5[%c0_25, %c0_26, %c0_27], %49 {strides = array<i32>} : memref<1x2x1xf32, #tpu.memory_space<vmem>>, vector<1x2x1xf32>,
      %c0_28 = arith.constant 0 : index
      %c0_29 = arith.constant 0 : index
      %50 = vector.load %arg8[%c0_28, %c0_29] : memref<2x1xi32, #tpu.memory_space<vmem>>, vector<2x1xi32>
      %c0_30 = arith.constant 0 : index
      %c0_31 = arith.constant 0 : index
      %c0_32 = arith.constant 0 : index
      %51 = vector.load %arg6[%c0_30, %c0_31, %c0_32] : memref<1x2x1xi32, #tpu.memory_space<vmem>>, vector<1x2x1xi32>
      %52 = vector.shape_cast %51 : vector<1x2x1xi32> to vector<2x1xi32>
      %53 = vector.shape_cast %50 : vector<2x1xi32> to vector<1x2x1xi32>
      tpu.vector_store %arg6[%c0_30, %c0_31, %c0_32], %53 {strides = array<i32>} : memref<1x2x1xi32, #tpu.memory_space<vmem>>, vector<1x2x1xi32>,
    } else {
    }
    return
  }
  func.func @transform_0(%arg0: i32, %arg1: i32) -> (i32, i32) {
    %c0_i32 = arith.constant 0 : i32
    %c0_i32_0 = arith.constant 0 : i32
    %c0_i32_1 = arith.constant 0 : i32
    return %c0_i32, %c0_i32_0 : i32, i32
  }
  func.func @transform_1(%arg0: i32, %arg1: i32) -> (i32, i32) {
    %c1_i32 = arith.constant 1 : i32
    %0 = arith.muli %arg0, %c1_i32 : i32
    %1 = arith.addi %0, %arg1 : i32
    %c0_i32 = arith.constant 0 : i32
    %c0_i32_0 = arith.constant 0 : i32
    return %1, %c0_i32 : i32, i32
  }
  func.func @transform_2(%arg0: i32, %arg1: i32) -> (i32, i32) {
    %c1_i32 = arith.constant 1 : i32
    %0 = arith.muli %arg0, %c1_i32 : i32
    %1 = arith.addi %0, %arg1 : i32
    %c0_i32 = arith.constant 0 : i32
    %c0_i32_0 = arith.constant 0 : i32
    return %c0_i32, %1 : i32, i32
  }
  func.func @transform_3(%arg0: i32, %arg1: i32) -> (i32, i32, i32) {
    %c0_i32 = arith.constant 0 : i32
    %c0_i32_0 = arith.constant 0 : i32
    %c0_i32_1 = arith.constant 0 : i32
    return %arg0, %c0_i32, %c0_i32_0 : i32, i32, i32
  }
  func.func @transform_4(%arg0: i32, %arg1: i32) -> (i32, i32, i32) {
    %c0_i32 = arith.constant 0 : i32
    %c0_i32_0 = arith.constant 0 : i32
    %c0_i32_1 = arith.constant 0 : i32
    return %arg0, %c0_i32, %c0_i32_0 : i32, i32, i32
  }
}

</mosaic_0001>

<bundles_post_ra>
// kernel: tpu_custom_call.1
= control target key start
LH: loop header
LB: loop body
LE: loop exit
PB: predicated region body
PF: predicated region fallthrough
CT: control target
= control target key end

     0   :  { %vm543_vm0 = vcmask 261120   ;;  %vm890_vm1 = vcmask 1041408   ;;  %vm71_vm3 = vcmask 1024   ;;  %s1698_s1 = inlined_call_operand.vmem [shape: bf16[1000,32], index: 1, kind: input, shape index: {}]   ;;  %s1699_s0 = inlined_call_operand.vmem [shape: bf16[2,32], index: 0, kind: input, shape index: {}]   ;;  %s1700_s2 = inlined_call_operand.vmem [shape: f32[1,1024], index: 2, kind: input, shape index: {}]   ;;  %s1701_s3 = inlined_call_operand.vmem [shape: f32[1,2,1], index: 3, kind: output, shape index: {0}]   ;;  %s1702_s4 = inlined_call_operand.vmem [shape: s32[1,2,1], index: 4, kind: output, shape index: {1}]  }
   0x1   :  { %v1273_v0 = vld [vmem:[%s1698_s1 + $0x38] sm:$0xff]  ;;  %v1272_v8 = vld [vmem:[%s1698_s1 + $0x30] sm:$0xff]  ;;  %v1271_v16 = vld [vmem:[%s1698_s1 + $0x28] sm:$0xff] }
   0x2   :  { %v1281_v1 = vld [vmem:[%s1698_s1 + $0x78] sm:$0xff]  ;;  %v569_v4 = vsel %vm543_vm0, %v1273_v0, 0  ;;  %v1280_v9 = vld [vmem:[%s1698_s1 + $0x70] sm:$0xff]  ;;  %v566_v12 = vsel %vm543_vm0, %v1272_v8, 0  ;;  %v1279_v17 = vld [vmem:[%s1698_s1 + $0x68] sm:$0xff]  ;;  %v563_v20 = vsel %vm543_vm0, %v1271_v16, 0 }
   0x3   :  { %v1289_v2 = vld [vmem:[%s1698_s1 + $0xb8] sm:$0xff]  ;;  %v593_v5 = vsel %vm543_vm0, %v1281_v1, 0  ;;  %739 = vmatpush.bf16.xpose.msra.mxu0 %v569_v4  ;;  %v1288_v10 = vld [vmem:[%s1698_s1 + $0xb0] sm:$0xff]  ;;  %v590_v13 = vsel %vm543_vm0, %v1280_v9, 0  ;;  %v1287_v18 = vld [vmem:[%s1698_s1 + $0xa8] sm:$0xff]  ;;  %v587_v21 = vsel %vm543_vm0, %v1279_v17, 0 }
   0x4   :  { %v1297_v3 = vld [vmem:[%s1698_s1 + $0xf8] sm:$0xff]  ;;  %v617_v6 = vsel %vm543_vm0, %v1289_v2, 0  ;;  %752 = vmatpush.bf16.xpose.msra.mxu1 %v593_v5  ;;  %v1296_v11 = vld [vmem:[%s1698_s1 + $0xf0] sm:$0xff]  ;;  %v614_v14 = vsel %vm543_vm0, %v1288_v10, 0  ;;  %v1295_v19 = vld [vmem:[%s1698_s1 + $0xe8] sm:$0xff]  ;;  %v611_v22 = vsel %vm543_vm0, %v1287_v18, 0 }
   0x5   :  { %v641_v7 = vsel %vm543_vm0, %v1297_v3, 0  ;;  %765 = vmatpush.bf16.xpose.msra.mxu2 %v617_v6  ;;  %v638_v15 = vsel %vm543_vm0, %v1296_v11, 0  ;;  %v635_v23 = vsel %vm543_vm0, %v1295_v19, 0  ;;  %v1270_v24 = vld [vmem:[%s1698_s1 + $0x20] sm:$0xff]  ;;  %v1269_v32 = vld [vmem:[%s1698_s1 + $0x18] sm:$0xff]  ;;  %v1268_v40 = vld [vmem:[%s1698_s1 + $0x10] sm:$0xff] }
   0x6   :  { %778 = vmatpush.bf16.xpose.msra.mxu3 %v641_v7  ;;  %v1278_v25 = vld [vmem:[%s1698_s1 + $0x60] sm:$0xff]  ;;  %v560_v28 = vsel %vm543_vm0, %v1270_v24, 0  ;;  %v1277_v33 = vld [vmem:[%s1698_s1 + $0x58] sm:$0xff]  ;;  %v557_v36 = vsel %vm543_vm0, %v1269_v32, 0  ;;  %v1276_v41 = vld [vmem:[%s1698_s1 + $0x50] sm:$0xff]  ;;  %v554_v44 = vsel %vm543_vm0, %v1268_v40, 0 }
   0x7   :  { %v1286_v26 = vld [vmem:[%s1698_s1 + $0xa0] sm:$0xff]  ;;  %v584_v29 = vsel %vm543_vm0, %v1278_v25, 0  ;;  %v1285_v34 = vld [vmem:[%s1698_s1 + $0x98] sm:$0xff]  ;;  %v581_v37 = vsel %vm543_vm0, %v1277_v33, 0  ;;  %v1284_v42 = vld [vmem:[%s1698_s1 + $0x90] sm:$0xff]  ;;  %v578_v45 = vsel %vm543_vm0, %v1276_v41, 0 }
   0x8   :  { %v1294_v27 = vld [vmem:[%s1698_s1 + $0xe0] sm:$0xff]  ;;  %v608_v30 = vsel %vm543_vm0, %v1286_v26, 0  ;;  %v1293_v35 = vld [vmem:[%s1698_s1 + $0xd8] sm:$0xff]  ;;  %v605_v38 = vsel %vm543_vm0, %v1285_v34, 0  ;;  %v1292_v43 = vld [vmem:[%s1698_s1 + $0xd0] sm:$0xff]  ;;  %v602_v46 = vsel %vm543_vm0, %v1284_v42, 0 }
   0x9   :  { %v632_v31 = vsel %vm543_vm0, %v1294_v27, 0  ;;  %v629_v39 = vsel %vm543_vm0, %v1293_v35, 0  ;;  %v626_v47 = vsel %vm543_vm0, %v1292_v43, 0  ;;  %v1267_v48 = vld [vmem:[%s1698_s1 + $0x8] sm:$0xff]  ;;  %v1266_v56 = vld [vmem:[%s1698_s1] sm:$0xff]  ;;  %v1305_v60 = vld [vmem:[%s1698_s1 + $0x138] sm:$0xff] }
   0xa   :  { %v1275_v49 = vld [vmem:[%s1698_s1 + $0x48] sm:$0xff]  ;;  %v551_v52 = vsel %vm543_vm0, %v1267_v48, 0  ;;  %v1274_v57 = vld [vmem:[%s1698_s1 + $0x40] sm:$0xff]  ;;  %v1313_v61 = vld [vmem:[%s1698_s1 + $0x178] sm:$0xff]  ;;  %v548_v0 = vsel %vm543_vm0, %v1266_v56, 0  ;;  %v665_v4 = vsel %vm543_vm0, %v1305_v60, 0 }
   0xb   :  { %740 = vmatpush.bf16.xpose.msra.mxu0 %v566_v12  ;;  %v1283_v50 = vld [vmem:[%s1698_s1 + $0x88] sm:$0xff]  ;;  %v575_v53 = vsel %vm543_vm0, %v1275_v49, 0  ;;  %v1282_v58 = vld [vmem:[%s1698_s1 + $0x80] sm:$0xff]  ;;  %v1321_v62 = vld [vmem:[%s1698_s1 + $0x1b8] sm:$0xff]  ;;  %v572_v1 = vsel %vm543_vm0, %v1274_v57, 0  ;;  %v689_v5 = vsel %vm543_vm0, %v1313_v61, 0 }
   0xc   :  { %753 = vmatpush.bf16.xpose.msra.mxu1 %v590_v13  ;;  %v1291_v51 = vld [vmem:[%s1698_s1 + $0xc8] sm:$0xff]  ;;  %v599_v54 = vsel %vm543_vm0, %v1283_v50, 0  ;;  %v1290_v59 = vld [vmem:[%s1698_s1 + $0xc0] sm:$0xff]  ;;  %v1329_v63 = vld [vmem:[%s1698_s1 + $0x1f8] sm:$0xff]  ;;  %v596_v2 = vsel %vm543_vm0, %v1282_v58, 0  ;;  %v713_v6 = vsel %vm543_vm0, %v1321_v62, 0 }
   0xd   :  { %766 = vmatpush.bf16.xpose.msra.mxu2 %v614_v14  ;;  %v623_v55 = vsel %vm543_vm0, %v1291_v51, 0  ;;  %v620_v3 = vsel %vm543_vm0, %v1290_v59, 0  ;;  %v737_v7 = vsel %vm543_vm0, %v1329_v63, 0  ;;  %v1304_v8 = vld [vmem:[%s1698_s1 + $0x130] sm:$0xff]  ;;  %v1518_v12 = vld [vmem:[%s1699_s0] sm:$0x1] }
   0xe   :  { %779 = vmatpush.bf16.xpose.msra.mxu3 %v638_v15  ;;  %v1312_v9 = vld [vmem:[%s1698_s1 + $0x170] sm:$0xff]  ;;  %v662_v13 = vsel %vm543_vm0, %v1304_v8, 0  ;;  %v1303_v17 = vld [vmem:[%s1698_s1 + $0x128] sm:$0xff]  ;;  %v1302_v25 = vld [vmem:[%s1698_s1 + $0x120] sm:$0xff] }
   0xf   :  { %v1320_v10 = vld [vmem:[%s1698_s1 + $0x1b0] sm:$0xff]  ;;  %v686_v14 = vsel %vm543_vm0, %v1312_v9, 0  ;;  %v1311_v18 = vld [vmem:[%s1698_s1 + $0x168] sm:$0xff]  ;;  %v1310_v26 = vld [vmem:[%s1698_s1 + $0x160] sm:$0xff]  ;;  %v843_v9 = vlaneseq }
  0x10   :  { %v1328_v11 = vld [vmem:[%s1698_s1 + $0x1f0] sm:$0xff]  ;;  %v710_v15 = vsel %vm543_vm0, %v1320_v10, 0  ;;  %v1319_v19 = vld [vmem:[%s1698_s1 + $0x1a8] sm:$0xff]  ;;  %v1318_v27 = vld [vmem:[%s1698_s1 + $0x1a0] sm:$0xff] }
  0x11   :  { %v734_v16 = vsel %vm543_vm0, %v1328_v11, 0  ;;  %v1301_v33 = vld [vmem:[%s1698_s1 + $0x118] sm:$0xff]  ;;  %v1300_v41 = vld [vmem:[%s1698_s1 + $0x110] sm:$0xff]  ;;  %v1299_v49 = vld [vmem:[%s1698_s1 + $0x108] sm:$0xff] }
  0x12   :  { %v1309_v34 = vld [vmem:[%s1698_s1 + $0x158] sm:$0xff]  ;;  %v1308_v42 = vld [vmem:[%s1698_s1 + $0x150] sm:$0xff]  ;;  %v1307_v50 = vld [vmem:[%s1698_s1 + $0x148] sm:$0xff] }
  0x13   :  { %741 = vmatpush.bf16.xpose.msra.mxu0 %v563_v20  ;;  %v1327_v20 = vld [vmem:[%s1698_s1 + $0x1e8] sm:$0xff]  ;;  %v1317_v35 = vld [vmem:[%s1698_s1 + $0x198] sm:$0xff]  ;;  %v1316_v43 = vld [vmem:[%s1698_s1 + $0x190] sm:$0xff] }
  0x14   :  { %754 = vmatpush.bf16.xpose.msra.mxu1 %v587_v21  ;;  %v659_v21 = vsel %vm543_vm0, %v1303_v17, 0  ;;  %v731_v24 = vsel %vm543_vm0, %v1327_v20, 0  ;;  %v1315_v51 = vld [vmem:[%s1698_s1 + $0x188] sm:$0xff]  ;;  %v1298_v57 = vld [vmem:[%s1698_s1 + $0x100] sm:$0xff] }
  0x15   :  { %767 = vmatpush.bf16.xpose.msra.mxu2 %v611_v22  ;;  %v683_v22 = vsel %vm543_vm0, %v1311_v18, 0  ;;  %v1306_v58 = vld [vmem:[%s1698_s1 + $0x140] sm:$0xff]  ;;  %v644_v61 = vsel %vm543_vm0, %v1298_v57, 0 }
  0x16   :  { %780 = vmatpush.bf16.xpose.msra.mxu3 %v635_v23  ;;  %v707_v23 = vsel %vm543_vm0, %v1319_v19, 0  ;;  %v1314_v59 = vld [vmem:[%s1698_s1 + $0x180] sm:$0xff]  ;;  %v668_v62 = vsel %vm543_vm0, %v1306_v58, 0 }
  0x17   :  { %v1322_v60 = vld [vmem:[%s1698_s1 + $0x1c0] sm:$0xff]  ;;  %v692_v63 = vsel %vm543_vm0, %v1314_v59, 0 }
  0x18   :  { %v205_v10 = vld [vmem:[%s1700_s2] sm:$0xff] }
  0x19   :  { %v211_v11 = vperm.slane %v205_v10, 4  ;;  %v208_v17 = vperm.slane %v205_v10, 1  ;;  %v209_v18 = vperm.slane %v205_v10, 2  ;;  %v210_v19 = vperm.slane %v205_v10, 3 }
  0x1b   :  { %742 = vmatpush.bf16.xpose.msra.mxu0 %v560_v28  ;;  %v1326_v28 = vld [vmem:[%s1698_s1 + $0x1e0] sm:$0xff] }
  0x1c   :  { %755 = vmatpush.bf16.xpose.msra.mxu1 %v584_v29  ;;  %v656_v29 = vsel %vm543_vm0, %v1302_v25, 0  ;;  %v728_v32 = vsel %vm543_vm0, %v1326_v28, 0 }
  0x1d   :  { %768 = vmatpush.bf16.xpose.msra.mxu2 %v608_v30  ;;  %v680_v30 = vsel %vm543_vm0, %v1310_v26, 0 }
  0x1e   :  { %781 = vmatpush.bf16.xpose.msra.mxu3 %v632_v31  ;;  %v704_v31 = vsel %vm543_vm0, %v1318_v27, 0 }
  0x23   :  { %743 = vmatpush.bf16.xpose.msra.mxu0 %v557_v36  ;;  %v1325_v36 = vld [vmem:[%s1698_s1 + $0x1d8] sm:$0xff] }
  0x24   :  { %756 = vmatpush.bf16.xpose.msra.mxu1 %v581_v37  ;;  %v653_v37 = vsel %vm543_vm0, %v1301_v33, 0  ;;  %v725_v40 = vsel %vm543_vm0, %v1325_v36, 0 }
  0x25   :  { %769 = vmatpush.bf16.xpose.msra.mxu2 %v605_v38  ;;  %v677_v38 = vsel %vm543_vm0, %v1309_v34, 0 }
  0x26   :  { %782 = vmatpush.bf16.xpose.msra.mxu3 %v629_v39  ;;  %v701_v39 = vsel %vm543_vm0, %v1317_v35, 0 }
  0x2b   :  { %744 = vmatpush.bf16.xpose.msra.mxu0 %v554_v44  ;;  %v1324_v44 = vld [vmem:[%s1698_s1 + $0x1d0] sm:$0xff] }
  0x2c   :  { %757 = vmatpush.bf16.xpose.msra.mxu1 %v578_v45  ;;  %v650_v45 = vsel %vm543_vm0, %v1300_v41, 0  ;;  %v722_v48 = vsel %vm543_vm0, %v1324_v44, 0 }
  0x2d   :  { %770 = vmatpush.bf16.xpose.msra.mxu2 %v602_v46  ;;  %v674_v46 = vsel %vm543_vm0, %v1308_v42, 0 }
  0x2e   :  { %783 = vmatpush.bf16.xpose.msra.mxu3 %v626_v47  ;;  %v698_v47 = vsel %vm543_vm0, %v1316_v43, 0 }
  0x33   :  { %745 = vmatpush.bf16.xpose.msra.mxu0 %v551_v52  ;;  %v1323_v52 = vld [vmem:[%s1698_s1 + $0x1c8] sm:$0xff] }
  0x34   :  { %758 = vmatpush.bf16.xpose.msra.mxu1 %v575_v53  ;;  %v647_v53 = vsel %vm543_vm0, %v1299_v49, 0  ;;  %v719_v56 = vsel %vm543_vm0, %v1323_v52, 0 }
  0x35   :  { %771 = vmatpush.bf16.xpose.msra.mxu2 %v599_v54  ;;  %v671_v54 = vsel %vm543_vm0, %v1307_v50, 0 }
  0x36   :  { %784 = vmatpush.bf16.xpose.msra.mxu3 %v623_v55  ;;  %v695_v55 = vsel %vm543_vm0, %v1315_v51, 0 }
  0x3b   :  { %746 = vmatpush.bf16.xpose.msra.mxu0 %v548_v0  ;;  %v716_v0 = vsel %vm543_vm0, %v1322_v60, 0 }
  0x3c   :  { %759 = vmatpush.bf16.xpose.msra.mxu1 %v572_v1 }
  0x3d   :  { %772 = vmatpush.bf16.xpose.msra.mxu2 %v596_v2 }
  0x3e   :  { %785 = vmatpush.bf16.xpose.msra.mxu3 %v620_v3 }
  0x42   :  { %1258 = vmatmul.msk.bf16.vlgmr.msra.gmra.mxu0 %vm543_vm0, %v1518_v12 }
  0x43   :  { %791 = vmatpush.bf16.xpose.msrb.mxu0 %v665_v4  ;;  %1259 = vmatmul.msk.bf16.vlgmr.msra.gmra.mxu1 %vm543_vm0, %v1518_v12 }
  0x44   :  { %804 = vmatpush.bf16.xpose.msrb.mxu1 %v689_v5  ;;  %1260 = vmatmul.msk.bf16.vlgmr.msra.gmra.mxu2 %vm543_vm0, %v1518_v12 }
  0x45   :  { %817 = vmatpush.bf16.xpose.msrb.mxu2 %v713_v6  ;;  %1261 = vmatmul.msk.bf16.vlgmr.msra.gmra.mxu3 %vm543_vm0, %v1518_v12 }
  0x46   :  { %830 = vmatpush.bf16.xpose.msrb.mxu3 %v737_v7 }
  0x4b   :  { %792 = vmatpush.bf16.xpose.msrb.mxu0 %v662_v13  ;;  %v212_v13 = vperm.slane %v205_v10, 5 }
  0x4c   :  { %805 = vmatpush.bf16.xpose.msrb.mxu1 %v686_v14  ;;  %v1639_v14 = vand.u32 127, %v843_v9 }
  0x4d   :  { %818 = vmatpush.bf16.xpose.msrb.mxu2 %v710_v15 }
  0x4e   :  { %831 = vmatpush.bf16.xpose.msrb.mxu3 %v734_v16  ;;  %v847_v57 = vadd.s32 384, %v1639_v14  ;;  %v848_v58 = vadd.s32 512, %v1639_v14  ;;  %v849_v59 = vadd.s32 640, %v1639_v14  ;;  %v850_v60 = vadd.s32 768, %v1639_v14 }
  0x53   :  { %793 = vmatpush.bf16.xpose.msrb.mxu0 %v659_v21 }
  0x54   :  { %806 = vmatpush.bf16.xpose.msrb.mxu1 %v683_v22  ;;  %v851_v22 = vadd.s32 896, %v1639_v14 }
  0x55   :  { %819 = vmatpush.bf16.xpose.msrb.mxu2 %v707_v23  ;;  %v213_v23 = vperm.slane %v205_v10, 6 }
  0x56   :  { %832 = vmatpush.bf16.xpose.msrb.mxu3 %v731_v24  ;;  %v214_v24 = vperm.slane %v205_v10, 7  ;;  %vm865_vm2 = vcmp.lt.s32.totalorder %v851_v22, 1000 }
  0x5b   :  { %794 = vmatpush.bf16.xpose.msrb.mxu0 %v656_v29 }
  0x5c   :  { %807 = vmatpush.bf16.xpose.msrb.mxu1 %v680_v30 }
  0x5d   :  { %820 = vmatpush.bf16.xpose.msrb.mxu2 %v704_v31 }
  0x5e   :  { %833 = vmatpush.bf16.xpose.msrb.mxu3 %v728_v32 }
  0x63   :  { %795 = vmatpush.bf16.xpose.msrb.mxu0 %v653_v37 }
  0x64   :  { %808 = vmatpush.bf16.xpose.msrb.mxu1 %v677_v38 }
  0x65   :  { %821 = vmatpush.bf16.xpose.msrb.mxu2 %v701_v39 }
  0x66   :  { %834 = vmatpush.bf16.xpose.msrb.mxu3 %v725_v40 }
  0x6b   :  { %796 = vmatpush.bf16.xpose.msrb.mxu0 %v650_v45 }
  0x6c   :  { %809 = vmatpush.bf16.xpose.msrb.mxu1 %v674_v46 }
  0x6d   :  { %822 = vmatpush.bf16.xpose.msrb.mxu2 %v698_v47 }
  0x6e   :  { %835 = vmatpush.bf16.xpose.msrb.mxu3 %v722_v48 }
  0x73   :  { %797 = vmatpush.bf16.xpose.msrb.mxu0 %v647_v53  ;;  %v1332_v53 = vmov -inf  }
  0x74   :  { %810 = vmatpush.bf16.xpose.msrb.mxu1 %v671_v54  ;;  %72 = vst.msk [vmem:[#allocation2] sm:$0x3] %vm71_vm3, %v1332_v53  ;;  %v845_v54 = vadd.s32 128, %v1639_v14 }
  0x75   :  { %823 = vmatpush.bf16.xpose.msrb.mxu2 %v695_v55  ;;  %v846_v55 = vadd.s32 256, %v1639_v14 }
  0x76   :  { %836 = vmatpush.bf16.xpose.msrb.mxu3 %v719_v56 }
  0x7b   :  { %798 = vmatpush.bf16.xpose.msrb.mxu0 %v644_v61  ;;  %v1659_v61 = vld [vmem:[#allocation2] sm:$0x3] }
  0x7c   :  { %811 = vmatpush.bf16.xpose.msrb.mxu1 %v668_v62  ;;  %v975_v62 = vld [vmem:[#allocation2] sm:$0x3] }
  0x7d   :  { %824 = vmatpush.bf16.xpose.msrb.mxu2 %v692_v63 }
  0x7e   :  { %837 = vmatpush.bf16.xpose.msrb.mxu3 %v716_v0 }
  0x82   :  { %1262 = vmatmul.msk.bf16.vlgmr.msrb.gmra.mxu0 %vm543_vm0, %v1518_v12 }
  0x83   :  { %1263 = vmatmul.msk.bf16.vlgmr.msrb.gmra.mxu1 %vm543_vm0, %v1518_v12 }
  0x84   :  { %1264 = vmatmul.msk.bf16.vlgmr.msrb.gmra.mxu2 %vm543_vm0, %v1518_v12 }
  0x85   :  { %1265 = vmatmul.msk.bf16.vlgmr.msrb.gmra.mxu3 %vm543_vm0, %v1518_v12  ;;  %v207_v12 = vperm.slane %v205_v10, 0 }
  0xbf   :  { %v748_v1 = vpop.f32.mrf.mxu0 }
  0xc0   :  { %v761_v2 = vpop.f32.mrf.mxu1  ;;  %v749_v25 = vadd.f32 %v748_v1, %v207_v12 }
  0xc1   :  { %v762_v26 = vadd.f32 %v761_v2, %v208_v17 }
  0xc2   :  { %v891_v37 = vsel %vm890_vm1, %v749_v25, -inf }
  0xc3   :  { %v892_v38 = vsel %vm890_vm1, %v762_v26, -inf }
  0xc7   :  { %v774_v4 = vpop.f32.mrf.mxu2  ;;  %v750_v5 = vpop.f32.mrf.mxu0 }
  0xc8   :  { %v787_v3 = vpop.f32.mrf.mxu3  ;;  %v763_v6 = vpop.f32.mrf.mxu1  ;;  %v775_v27 = vadd.f32 %v774_v4, %v209_v18 }
  0xc9   :  { %v788_v28 = vadd.f32 %v787_v3, %v210_v19 }
  0xca   :  { %v893_v39 = vsel %vm890_vm1, %v775_v27, -inf }
  0xcb   :  { %v894_v44 = vsel %vm890_vm1, %v788_v28, -inf }
  0xcf   :  { %v776_v8 = vpop.f32.mrf.mxu2 }
  0xd0   :  { %v789_v7 = vpop.f32.mrf.mxu3 }
  0xff   :  { %v800_v15 = vpop.f32.mrf.mxu0 }
 0x100   :  { %v813_v16 = vpop.f32.mrf.mxu1  ;;  %v801_v20 = vadd.f32 %v800_v15, %v211_v11 }
 0x101   :  { %v814_v21 = vadd.f32 %v813_v16, %v212_v13 }
 0x102   :  { %v895_v29 = vsel %vm890_vm1, %v801_v20, -inf }
 0x103   :  { %v897_v30 = vsel %vm890_vm1, %v814_v21, -inf  ;;  %v896_v40 = vmax.f32 %v891_v37, %v895_v29 }
 0x104   :  { %v898_v41 = vmax.f32 %v892_v38, %v897_v30 }
 0x106   :  { %v903_v48 = vmax.f32 %v896_v40, %v898_v41 }
 0x107   :  { %v826_v31 = vpop.f32.mrf.mxu2  ;;  %v802_v35 = vpop.f32.mrf.mxu0 }
 0x108   :  { %v839_v32 = vpop.f32.mrf.mxu3  ;;  %v827_v33 = vadd.f32 %v826_v31, %v213_v23  ;;  %v815_v36 = vpop.f32.mrf.mxu1 }
 0x109   :  { %v840_v34 = vadd.f32 %v839_v32, %v214_v24 }
 0x10a   :  { %v899_v42 = vsel %vm890_vm1, %v827_v33, -inf }
 0x10b   :  { %v889_v43 = vsel %vm865_vm2, %v840_v34, -inf  ;;  %v900_v45 = vmax.f32 %v893_v39, %v899_v42 }
 0x10c   :  { %v901_v46 = vsel %vm890_vm1, %v889_v43, -inf }
 0x10d   :  { %v902_v47 = vmax.f32 %v894_v44, %v901_v46 }
 0x10f   :  { %v904_v49 = vmax.f32 %v900_v45, %v902_v47  ;;  %v828_v50 = vpop.f32.mrf.mxu2 }
 0x110   :  { %v841_v51 = vpop.f32.mrf.mxu3 }
 0x111   :  { %v905_v52 = vmax.f32 %v903_v48, %v904_v49 }
 0x113   :  { %906 = vmax.xlane.f32.xlu0 %v905_v52 }
 0x186   :  { %v1653_v56 = vpop.xlane.xlu0 %906 }
 0x187   :  { %vm917_vm4 = vcmp.eq.f32.partialorder %v749_v25, %v1653_v56  ;;  %vm918_vm5 = vcmp.eq.f32.partialorder %v762_v26, %v1653_v56  ;;  %vm919_vm6 = vcmp.eq.f32.partialorder %v775_v27, %v1653_v56  ;;  %vm920_vm7 = vcmp.eq.f32.partialorder %v788_v28, %v1653_v56 }
 0x188   :  { %vm921_vm8 = vcmp.eq.f32.partialorder %v801_v20, %v1653_v56  ;;  %vm922_vm9 = vcmp.eq.f32.partialorder %v814_v21, %v1653_v56  ;;  %vm923_vm10 = vcmp.eq.f32.partialorder %v827_v33, %v1653_v56  ;;  %vm924_vm11 = vcmp.eq.f32.partialorder %v889_v43, %v1653_v56 }
 0x189   :  { %v925_v63 = vsel %vm917_vm4, %v1639_v14, 2147483647  ;;  %v926_v0 = vsel %vm918_vm5, %v845_v54, 2147483647  ;;  %v927_v1 = vsel %vm919_vm6, %v846_v55, 2147483647  ;;  %vm970_vm12 = vcmp.gt.f32.partialorder %v1653_v56, %v1659_v61 }
 0x18a   :  { %v928_v2 = vsel %vm920_vm7, %v847_v57, 2147483647  ;;  %v929_v3 = vsel %vm921_vm8, %v848_v58, 2147483647  ;;  %v930_v4 = vsel %vm922_vm9, %v849_v59, 2147483647  ;;  %v976_v8 = vsel %vm970_vm12, %v1653_v56, %v975_v62 }
 0x18b   :  { %v931_v5 = vsel %vm923_vm10, %v850_v60, 2147483647  ;;  %v932_v6 = vsel %vm924_vm11, %v851_v22, 2147483647  ;;  %v933_v7 = vsel %vm890_vm1, %v925_v63, 2147483647 }
 0x18c   :  { %v934_v9 = vsel %vm890_vm1, %v926_v0, 2147483647  ;;  %v935_v10 = vsel %vm890_vm1, %v927_v1, 2147483647  ;;  %v936_v11 = vsel %vm890_vm1, %v928_v2, 2147483647 }
 0x18d   :  { %v937_v13 = vsel %vm890_vm1, %v929_v3, 2147483647  ;;  %v940_v14 = vsel %vm890_vm1, %v930_v4, 2147483647  ;;  %v943_v15 = vsel %vm890_vm1, %v931_v5, 2147483647 }
 0x18e   :  { %vm938_vm13 = vcmp.lt.s32.totalorder %v933_v7, %v937_v13  ;;  %vm941_vm14 = vcmp.lt.s32.totalorder %v934_v9, %v940_v14  ;;  %vm944_vm15 = vcmp.lt.s32.totalorder %v935_v10, %v943_v15  ;;  %v946_v16 = vsel %vm890_vm1, %v932_v6, 2147483647  ;;  %977 = vst.msk [vmem:[#allocation2] sm:$0x3] %vm71_vm3, %v976_v8 }
 0x18f   :  { %v939_v12 = vsel %vm938_vm13, %v933_v7, %v937_v13  ;;  %v942_v17 = vsel %vm941_vm14, %v934_v9, %v940_v14  ;;  %v945_v18 = vsel %vm944_vm15, %v935_v10, %v943_v15  ;;  %vm947_vm0 = vcmp.lt.s32.totalorder %v936_v11, %v946_v16 }
 0x190   :  { %v948_v19 = vsel %vm947_vm0, %v936_v11, %v946_v16  ;;  %vm949_vm2 = vcmp.lt.s32.totalorder %v939_v12, %v942_v17  ;;  %v1333_v26 = vmov 0  }
 0x191   :  { %v950_v20 = vsel %vm949_vm2, %v939_v12, %v942_v17  ;;  %vm951_vm4 = vcmp.lt.s32.totalorder %v945_v18, %v948_v19  ;;  %73 = vst.msk [vmem:[#allocation3] sm:$0x3] %vm71_vm3, %v1333_v26 }
 0x192   :  { %v952_v21 = vsel %vm951_vm4, %v945_v18, %v948_v19 }
 0x193   :  { %vm953_vm5 = vcmp.lt.s32.totalorder %v950_v20, %v952_v21 }
 0x194   :  { %v954_v22 = vsel %vm953_vm5, %v950_v20, %v952_v21 }
 0x195   :  { %v956_v23 = vshra.s32 %v954_v22, 16  ;;  %v981_v24 = vld [vmem:[#allocation2] sm:$0x3]  ;;  %v955_v27 = vand.u32 65535, %v954_v22 }
 0x196   :  { %982 = vst.msk [vmem:[%s1701_s3] sm:$0x3] %vm71_vm3, %v981_v24 }
 0x197   :  { %v958_v25 = vcvt.s32.f32 %v956_v23  ;;  %v957_v29 = vcvt.s32.f32 %v955_v27 }
 0x198   :  { %v971_v35 = vld [vmem:[#allocation3] sm:$0x3] }
 0x199   :  { %959 = vmin.xlane.f32.xlu0 %v958_v25 }
 0x20c   :  { %v960_v28 = vpop.xlane.xlu0 %959 }
 0x20d   :  { %vm961_vm1 = vcmp.eq.f32.partialorder %v958_v25, %v960_v28  ;;  %v966_v31 = vcvt.f32.s32 %v960_v28 }
 0x20e   :  { %v962_v30 = vsel %vm961_vm1, %v957_v29, inf }
 0x20f   :  { %963 = vmin.xlane.f32.xlu1 %v962_v30  ;;  %v967_v33 = vshll.u32 %v966_v31, 16 }
 0x282   :  { %v964_v32 = vpop.xlane.xlu1 %963 }
 0x283   :  { %v965_v34 = vcvt.f32.s32 %v964_v32 }
 0x285   :  { %v968_v36 = vadd.s32 %v967_v33, %v965_v34 }
 0x287   :  { %v972_v37 = vsel %vm970_vm12, %v968_v36, %v971_v35 }
 0x288   :  { %974 = vst.msk [vmem:[#allocation3] sm:$0x3] %vm71_vm3, %v972_v37 }
 0x28f   :  { %v983_v38 = vld [vmem:[#allocation3] sm:$0x3] }
 0x290   :  { %984 = vst.msk [vmem:[%s1702_s4] sm:$0x3] %vm71_vm3, %v983_v38 }

</bundles_post_ra>
